<compile_context>
chip_gen: v7x
topology: tpu7x:2x2x1
jax: 0.10.0
libtpu: 0.0.40
codegen_flags: <defaults>
</compile_context>

<pallas_src>
import functools

import jax
import jax.numpy as jnp
from jax.experimental import pallas as pl
from jax.experimental.pallas import tpu as pltpu


def _concat_meanpool_kernel(cls_ref, patch_ref, o_ref, *acc_scratch, inv_count):
    """Fused (cls ++ patch_tokens) mean-pool over one (tb, td) output tile.

    cls_ref:   [tb, td]      cls-token tile (VMEM-resident across the k axis)
    patch_ref: [tb, tn, td]  one chunk of patch tokens (streamed along k)
    o_ref:     [tb, td]      pooled output tile (resident across k)
    acc_scratch: optional [tb, td] f32 scratch; absent when o_ref is f32,
                 in which case o_ref itself is the accumulator.
    """
    acc_ref = acc_scratch[0] if acc_scratch else o_ref
    k = pl.program_id(2)

    @pl.when(k == 0)
    def _():
        # cls token contributes exactly once per output tile.
        acc_ref[...] = cls_ref[...].astype(jnp.float32)

    # Accumulate this chunk's token sum (XLU sublane reduction, f32 accumulate).
    acc_ref[...] += jnp.sum(patch_ref[...].astype(jnp.float32), axis=1)

    @pl.when(k == pl.num_programs(2) - 1)
    def _():
        o_ref[...] = (acc_ref[...] * inv_count).astype(o_ref.dtype)


def _vmem_limit_bytes():
    """Device-aware scoped-VMEM limit (v7x: 64 MiB/TC; v5e/v6e: 128 MiB)."""
    phys = 64 << 20  # conservative default (v7x-class)
    try:
        info = pltpu.get_tpu_info()
        phys = int(getattr(info, "vmem_capacity_bytes", phys))
    except Exception:
        pass
    if phys <= (64 << 20):
        return 40 << 20   # v7x: leave room in the 64 MiB/TC shared context
    return 80 << 20       # v5e/v6e: raise well above the tiny scoped default


def _divisor_tiles(dim, granularity):
    """Divisors of `dim` that are multiples of `granularity` (descending),
    always including the full extent (full-dim blocks are always legal)."""
    cands = {dim}
    for t in range(granularity, dim, granularity):
        if dim % t == 0:
            cands.add(t)
    return sorted(cands, reverse=True)


def _select_tiles(B, N, D, in_itemsize, out_itemsize, budget_bytes):
    """Jointly pick (tb, tn, td) against the VMEM budget.

    Footprint = 2*tb*tn*td*in  (patch double-buffer, streamed)
              + 2*tb*td*in     (cls tile, resident, double-buffered)
              + 2*tb*td*out    (output tile, resident, double-buffered)
              + tb*td*4        (f32 scratch, only when output is not f32)
    """
    sub_gran = 16 if in_itemsize < 4 else 8
    acc_per_elem = 0 if out_itemsize == 4 else 4

    def footprint(tb, tn, td):
        patch = 2 * tb * tn * td * in_itemsize
        cls = 2 * tb * td * in_itemsize
        out = 2 * tb * td * out_itemsize
        acc = tb * td * acc_per_elem
        return patch + cls + out + acc

    tb_cands = _divisor_tiles(B, sub_gran)
    tn_all = _divisor_tiles(N, sub_gran)
    # Token chunks below 32 make the ~0.35us per-grid-step overhead dominate
    # the DMA; only fall back below 32 if nothing larger divides N.
    tn_cands = [t for t in tn_all if t >= 32] or [min(tn_all)]
    # Full-D blocks first (one contiguous HBM segment per (batch, token) row),
    # then 128-lane stripes.
    td_cands = [D] + [t for t in _divisor_tiles(D, 128) if t != D]

    tb_min, tn_min = min(tb_cands), min(tn_cands)

    # 1) Feature tile: largest (prefer full D) that fits at minimal tb/tn.
    td = next(
        (t for t in td_cands if footprint(tb_min, tn_min, t) <= budget_bytes),
        td_cands[-1],
    )

    # 2) Batch tile: largest that fits; but keep >= 2 parallel grid tiles so a
    #    second TensorCore (v7x megacore) is never left idle when B allows it.
    tb_fit = [t for t in tb_cands if footprint(t, tn_min, td) <= budget_bytes] or [tb_min]
    tb = tb_fit[0]
    if (B // tb) * (D // td) < 2:
        two_core = [t for t in tb_fit if B // t >= 2]
        if two_core:
            tb = two_core[0]

    # 3) Token chunk: largest that still fits (bigger per-step DMA amortizes
    #    grid-step overhead; the budget caps it).
    tn_fit = [t for t in tn_cands if footprint(tb, t, td) <= budget_bytes] or [tn_min]
    tn = tn_fit[0]
    return tb, tn, td


def adapter_forward(cls_tokens, patch_tokens, *, tb=None, td=None, tn=None,
                    cast_inputs_to=None, patch_buffers=2):
    """JAX/Pallas equivalent of Adapter.forward after the backbone call.

    cls_tokens:   [B, D]     x['x_norm_clstoken']
    patch_tokens: [B, N, D]  x['x_norm_patchtokens']
    cast_inputs_to: optional dtype (e.g. jnp.bfloat16) to cast the token
        inputs to before the kernel (halves HBM bytes on this purely
        bandwidth-bound kernel; output keeps the original dtype).
    patch_buffers: pipeline depth for the patch stream (3 can hide DMA-setup
        bubbles on v7x if profiling shows exposed DMA; default 2).
    Returns pooled features [B, D] (= hom_pool(cat([cls, patch], dim=1))).
    """
    B, D = cls_tokens.shape
    B2, N, D2 = patch_tokens.shape
    assert B == B2 and D == D2

    out_dtype = cls_tokens.dtype
    if cast_inputs_to is not None:
        cls_tokens = cls_tokens.astype(cast_inputs_to)
        patch_tokens = patch_tokens.astype(cast_inputs_to)

    in_itemsize = jnp.dtype(cls_tokens.dtype).itemsize
    out_itemsize = jnp.dtype(out_dtype).itemsize
    out_is_f32 = jnp.dtype(out_dtype) == jnp.dtype(jnp.float32)

    vmem_limit = _vmem_limit_bytes()
    budget = (vmem_limit * 3) // 5  # ~60% of the limit: headroom for Mosaic

    a_tb, a_tn, a_td = _select_tiles(B, N, D, in_itemsize, out_itemsize, budget)
    tb = a_tb if tb is None else tb
    tn = a_tn if tn is None else tn
    td = a_td if td is None else td
    assert B % tb == 0 and N % tn == 0 and D % td == 0, (tb, tn, td)

    grid = (B // tb, D // td, N // tn)
    inv_count = 1.0 / float(N + 1)
    kernel = functools.partial(_concat_meanpool_kernel, inv_count=inv_count)

    patch_spec_kwargs = {}
    if patch_buffers != 2:
        patch_spec_kwargs["pipeline_mode"] = pl.Buffered(patch_buffers)

    return pl.pallas_call(
        kernel,
        out_shape=jax.ShapeDtypeStruct((B, D), out_dtype),
        grid=grid,
        in_specs=[
            # cls tile: index_map ignores k -> resident across the whole token
            # reduction (no re-DMA per chunk).
            pl.BlockSpec((tb, td), lambda i, j, k: (i, j)),
            # patch-token chunk: streamed along the reduction (last) grid axis.
            pl.BlockSpec((tb, tn, td), lambda i, j, k: (i, k, j),
                         **patch_spec_kwargs),
        ],
        # Output index_map also ignores k -> resident; for f32 outputs it is
        # used directly as the accumulator.
        out_specs=pl.BlockSpec((tb, td), lambda i, j, k: (i, j)),
        scratch_shapes=(
            [] if out_is_f32 else [pltpu.VMEM((tb, td), jnp.float32)]
        ),
        compiler_params=pltpu.CompilerParams(
            dimension_semantics=("parallel", "parallel", "arbitrary"),
            vmem_limit_bytes=vmem_limit,
        ),
    )(cls_tokens, patch_tokens)


if __name__ == "__main__":
    key = jax.random.PRNGKey(0)
    k_cls, k_patch = jax.random.split(key)

    # Small shapes consistent with the module's token layout:
    # batch=8, patch tokens=32, hidden=256 (lane-dense: 256 % 128 == 0).
    B, N, D = 8, 32, 256
    # TODO(synk): the DINOv2 backbone (self.adapter) is not translated; its
    # normalized cls/patch token outputs are synthesized here as inputs.
    cls_tokens = jax.random.normal(k_cls, (B, D), dtype=jnp.float32)
    patch_tokens = jax.random.normal(k_patch, (B, N, D), dtype=jnp.float32)

    # Reference: torch.cat((cls.unsqueeze(1), patch), dim=1) then mean pooling.
    ref = jnp.mean(
        jnp.concatenate([cls_tokens[:, None, :], patch_tokens], axis=1), axis=1
    )

    # 1) Footprint-aware auto tiling (f32 output -> accumulate into o_ref).
    out_auto = adapter_forward(cls_tokens, patch_tokens)
    jax.block_until_ready(out_auto)
    assert out_auto.shape == (B, D)
    assert jnp.allclose(out_auto, ref, atol=1e-5, rtol=1e-5)

    # 2) Explicit small tiles -> real multi-step grid (1, 2, 4): exercises the
    #    resident-output accumulator across the token-reduction axis.
    out_tiled = adapter_forward(cls_tokens, patch_tokens, tb=8, td=128, tn=8)
    jax.block_until_ready(out_tiled)
    assert jnp.allclose(out_tiled, ref, atol=1e-5, rtol=1e-5)

    # 3) bf16 input path (wrapper cast halves HBM bytes; f32 accumulation;
    #    output stays f32).
    out_bf16_in = adapter_forward(
        cls_tokens, patch_tokens, cast_inputs_to=jnp.bfloat16, tb=8, td=128, tn=16
    )
    jax.block_until_ready(out_bf16_in)
    assert jnp.allclose(out_bf16_in, ref, atol=3e-2, rtol=3e-2)

    # 4) bf16 inputs AND outputs (exercises the f32 scratch-accumulator branch).
    out_bf16 = adapter_forward(
        cls_tokens.astype(jnp.bfloat16), patch_tokens.astype(jnp.bfloat16)
    )
    jax.block_until_ready(out_bf16)
    assert jnp.allclose(out_bf16.astype(jnp.float32), ref, atol=3e-2, rtol=3e-2)

    print("KERNEL_OK")
</pallas_src>

<mosaic_0001>
module attributes {stable_mosaic.version = 11 : i64} {
  func.func @_concat_meanpool_kernel(%arg0: i32, %arg1: i32, %arg2: i32, %arg3: memref<8x256xf32, #tpu.memory_space<vmem>>, %arg4: memref<8x32x256xf32, #tpu.memory_space<vmem>>, %arg5: memref<8x256xf32, #tpu.memory_space<vmem>>) attributes {dimension_semantics = [#tpu.dimension_semantics<parallel>, #tpu.dimension_semantics<parallel>, #tpu.dimension_semantics<arbitrary>], iteration_bounds = array<i64: 1, 1, 1>, scalar_prefetch = 0 : i64, scratch_operands = 0 : i64, tpu.core_type = #tpu.core_type<tc>, window_params = [{transform_indices = @transform_0, window_bounds = array<i64: 8, 256>}, {transform_indices = @transform_1, window_bounds = array<i64: 8, 32, 256>}, {transform_indices = @transform_2, window_bounds = array<i64: 8, 256>}]} {
    %c0_i32 = arith.constant 0 : i32
    %0 = arith.cmpi eq, %arg2, %c0_i32 : i32
    %1 = arith.extui %0 : i1 to i32
    %c0_i32_0 = arith.constant 0 : i32
    %2 = arith.cmpi ne, %1, %c0_i32_0 : i32
    scf.if %2 {
      %c0_9 = arith.constant 0 : index
      %c0_10 = arith.constant 0 : index
      %11 = vector.load %arg3[%c0_9, %c0_10] : memref<8x256xf32, #tpu.memory_space<vmem>>, vector<8x256xf32>
      %c0_11 = arith.constant 0 : index
      %c0_12 = arith.constant 0 : index
      %12 = vector.load %arg5[%c0_11, %c0_12] : memref<8x256xf32, #tpu.memory_space<vmem>>, vector<8x256xf32>
      tpu.vector_store %arg5[%c0_11, %c0_12], %11 {strides = array<i32>} : memref<8x256xf32, #tpu.memory_space<vmem>>, vector<8x256xf32>,
    } else {
    }
    %c0 = arith.constant 0 : index
    %c0_1 = arith.constant 0 : index
    %3 = vector.load %arg5[%c0, %c0_1] : memref<8x256xf32, #tpu.memory_space<vmem>>, vector<8x256xf32>
    %c0_2 = arith.constant 0 : index
    %c0_3 = arith.constant 0 : index
    %c0_4 = arith.constant 0 : index
    %4 = vector.load %arg4[%c0_2, %c0_3, %c0_4] : memref<8x32x256xf32, #tpu.memory_space<vmem>>, vector<8x32x256xf32>
    %cst = arith.constant dense<0.000000e+00> : vector<8x256xf32>
    %5 = vector.multi_reduction <add>, %4, %cst [1] : vector<8x32x256xf32> to vector<8x256xf32>
    %6 = arith.addf %3, %5 : vector<8x256xf32>
    %c0_5 = arith.constant 0 : index
    %c0_6 = arith.constant 0 : index
    %7 = vector.load %arg5[%c0_5, %c0_6] : memref<8x256xf32, #tpu.memory_space<vmem>>, vector<8x256xf32>
    tpu.vector_store %arg5[%c0_5, %c0_6], %6 {strides = array<i32>} : memref<8x256xf32, #tpu.memory_space<vmem>>, vector<8x256xf32>,
    %c0_i32_7 = arith.constant 0 : i32
    %8 = arith.cmpi eq, %arg2, %c0_i32_7 : i32
    %9 = arith.extui %8 : i1 to i32
    %c0_i32_8 = arith.constant 0 : i32
    %10 = arith.cmpi ne, %9, %c0_i32_8 : i32
    scf.if %10 {
      %c0_9 = arith.constant 0 : index
      %c0_10 = arith.constant 0 : index
      %11 = vector.load %arg5[%c0_9, %c0_10] : memref<8x256xf32, #tpu.memory_space<vmem>>, vector<8x256xf32>
      %cst_11 = arith.constant 0.0303030312 : f32
      %12 = vector.broadcast %cst_11 : f32 to vector<8x256xf32>
      %13 = arith.mulf %11, %12 : vector<8x256xf32>
      %c0_12 = arith.constant 0 : index
      %c0_13 = arith.constant 0 : index
      %14 = vector.load %arg5[%c0_12, %c0_13] : memref<8x256xf32, #tpu.memory_space<vmem>>, vector<8x256xf32>
      tpu.vector_store %arg5[%c0_12, %c0_13], %13 {strides = array<i32>} : memref<8x256xf32, #tpu.memory_space<vmem>>, vector<8x256xf32>,
    } else {
    }
    return
  }
  func.func @transform_0(%arg0: i32, %arg1: i32, %arg2: i32) -> (i32, i32) {
    %c0_i32 = arith.constant 0 : i32
    return %arg0, %arg1 : i32, i32
  }
  func.func @transform_1(%arg0: i32, %arg1: i32, %arg2: i32) -> (i32, i32, i32) {
    %c0_i32 = arith.constant 0 : i32
    return %arg0, %arg2, %arg1 : i32, i32, i32
  }
  func.func @transform_2(%arg0: i32, %arg1: i32, %arg2: i32) -> (i32, i32) {
    %c0_i32 = arith.constant 0 : i32
    return %arg0, %arg1 : i32, i32
  }
}

</mosaic_0001>

<bundles_post_ra>
// kernel: tpu_custom_call.1
= control target key start
LH: loop header
LB: loop body
LE: loop exit
PB: predicated region body
PF: predicated region fallthrough
CT: control target
= control target key end

     0   :  { %7 = vsyncpa [#allocation3], 0  ;;  %s478_s0 = inlined_call_operand.hbm [shape: f32[8,256], index: 0, kind: input, shape index: {}]   ;;  %s479_s1 = inlined_call_operand.hbm [shape: f32[8,32,256], index: 1, kind: input, shape index: {}]   ;;  %s480_s2 = inlined_call_operand.hbm [shape: f32[8,256], index: 2, kind: output, shape index: {}]  }
   0x1   :  { %8 = vsyncpa [#allocation6], 0 }
   0x2   :  { %9 = vsyncpa [#allocation4], 0  ;;  %s401_s9 = smov [#allocation2]   ;;  %s402_s11 = smov [#allocation5]  }
   0x3   :  { %s16_s10 = sshll.u32 %s401_s9, 4  ;;  %s25_s12 = sshll.u32 %s402_s11, 4  ;;  %s17_s10 = int_to_ptr.vmem [resolvable:$true] %s16_s10  ;;  %s421_s12 = int_to_ptr.vmem [resolvable:$true] %s25_s12 }
   0x4   :  { %s329_s15 = scalar_lea.hbm %s478_s0, 256 }
   0x5   :  { %p330_p0 = scmp.ne.s32.totalorder %s478_s0, %s329_s15  ;;  %p333_p1 = scmp.lt.u32.totalorder %s329_s15, %s478_s0 }
   0x7   :  { %p335_p2 = pnand %p333_p1, %p330_p0 }
   0x9   :  { %338 = shalt.err (!%p335_p2)
}
   0xa   :  { %s339_s20 = scalar_lea.vmem %s17_s10, 256  ;;  %p344_p4 = scmp.lt.s32.totalorder %s17_s10, %s17_s10 }
   0xb   :  { %p340_p3 = scmp.ne.s32.totalorder %s17_s10, %s339_s20  ;;  %p345_p5 = scmp.lt.s32.totalorder %s339_s20, %s339_s20 }
   0xd   :  { %p346_p6 = por %p345_p5, %p344_p4 }
   0xf   :  { %p347_p7 = pnand %p346_p6, %p340_p3 }
  0x11   :  { %350 = shalt.err (!%p347_p7)
}
  0x12   :  { %19 = dma.hbm_to_vmem [thread:$0]  %s478_s0, 256, %s17_s10, [#allocation3]  }
  0x13   :  { %s351_s25 = scalar_lea.hbm %s479_s1, 8192 }
  0x14   :  { %p352_p8 = scmp.ne.s32.totalorder %s479_s1, %s351_s25  ;;  %p355_p9 = scmp.lt.u32.totalorder %s351_s25, %s479_s1 }
  0x16   :  { %p357_p10 = pnand %p355_p9, %p352_p8 }
  0x18   :  { %360 = shalt.err (!%p357_p10)
}
  0x19   :  { %s361_s30 = scalar_lea.vmem %s421_s12, 8192  ;;  %p366_p12 = scmp.lt.s32.totalorder %s421_s12, %s421_s12 }
  0x1a   :  { %p362_p11 = scmp.ne.s32.totalorder %s421_s12, %s361_s30  ;;  %p367_p13 = scmp.lt.s32.totalorder %s361_s30, %s361_s30 }
  0x1c   :  { %p368_p0 = por %p367_p13, %p366_p12 }
  0x1e   :  { %p369_p1 = pnand %p368_p0, %p362_p11 }
  0x20   :  { %372 = shalt.err (!%p369_p1)
}
  0x21   :  { %s403_s0 = smov 256   ;;  %s404_s3 = smov 16  }
  0x22   :  { %31 = dma.hbm_to_vmem [thread:$0]  %s479_s1, 8192, %s421_s12, [#allocation6], %s403_s0, %s403_s0, %s404_s3  }
  0x23   :  { %395 = dma.done.wait [#allocation3], 256  }
  0x24   :  { %396 = vsyncadd [#allocation3], 4294967040 }
  0x25   :  { %397 = dma.done.wait [#allocation6], 8192  }
  0x26   :  { %398 = vsyncadd [#allocation6], 4294959104  ;;  %v48_v0 = vld [vmem:[#allocation5] sm:$0xff]  ;;  %v50_v1 = vld [vmem:[#allocation5 + $0x10] sm:$0xff]  ;;  %vm272_vm0 = vcmask 1041409   ;;  %vm274_vm1 = vcmask 1042434  }
  0x27   :  { %v52_v2 = vld [vmem:[#allocation5 + $0x20] sm:$0xff]  ;;  %v58_v4 = vld [vmem:[#allocation5 + $0x50] sm:$0xff]  ;;  %v112_v6 = vadd.f32 %v50_v1, %v48_v0  ;;  %vm276_vm2 = vcmask 1043459   ;;  %vm278_vm3 = vcmask 1044484   ;;  %vm280_vm4 = vcmask 1045509   ;;  %s405_s1 = smov [#allocation7]  }
  0x28   :  { %v56_v3 = vld [vmem:[#allocation5 + $0x40] sm:$0xff]  ;;  %v54_v7 = vld [vmem:[#allocation5 + $0x30] sm:$0xff]  ;;  %vm282_vm5 = vcmask 1046534   ;;  %vm284_vm6 = vcmask 1047559   ;;  %s314_s6 = sshll.u32 %s405_s1, 4  ;;  %s315_s6 = int_to_ptr.vmem [resolvable:$true] %s314_s6 }
  0x29   :  { %v60_v5 = vld [vmem:[#allocation5 + $0x60] sm:$0xff]  ;;  %v66_v9 = vld [vmem:[#allocation5 + $0x90] sm:$0xff]  ;;  %v130_v10 = vadd.f32 %v58_v4, %v56_v3  ;;  %v113_v14 = vadd.f32 %v112_v6, %v52_v2  ;;  %s373_s7 = scalar_lea.vmem %s315_s6, 256  ;;  %p378_p3 = scmp.lt.s32.totalorder %s315_s6, %s315_s6 }
  0x2a   :  { %v64_v8 = vld [vmem:[#allocation5 + $0x80] sm:$0xff]  ;;  %v62_v11 = vld [vmem:[#allocation5 + $0x70] sm:$0xff]  ;;  %p374_p2 = scmp.ne.s32.totalorder %s315_s6, %s373_s7  ;;  %p379_p4 = scmp.lt.s32.totalorder %s373_s7, %s373_s7 }
  0x2b   :  { %v68_v12 = vld [vmem:[#allocation5 + $0xa0] sm:$0xff]  ;;  %v148_v15 = vadd.f32 %v66_v9, %v64_v8  ;;  %v70_v16 = vld [vmem:[#allocation5 + $0xb0] sm:$0xff]  ;;  %v131_v19 = vadd.f32 %v130_v10, %v60_v5  ;;  %v114_v23 = vadd.f32 %v113_v14, %v54_v7 }
  0x2c   :  { %v72_v13 = vld [vmem:[#allocation5 + $0xc0] sm:$0xff]  ;;  %v74_v17 = vld [vmem:[#allocation5 + $0xd0] sm:$0xff]  ;;  %p380_p5 = por %p379_p4, %p378_p3 }
  0x2d   :  { %v76_v18 = vld [vmem:[#allocation5 + $0xe0] sm:$0xff]  ;;  %v82_v21 = vld [vmem:[#allocation5 + $0x110] sm:$0xff]  ;;  %v149_v24 = vadd.f32 %v148_v15, %v68_v12  ;;  %v166_v25 = vadd.f32 %v74_v17, %v72_v13  ;;  %v132_v29 = vadd.f32 %v131_v19, %v62_v11  ;;  %v115_v34 = vrot.slane %v114_v23, 4  ;;  %v51_v17 = vld [vmem:[#allocation5 + $0x18] sm:$0xff] }
  0x2e   :  { %v80_v20 = vld [vmem:[#allocation5 + $0x100] sm:$0xff]  ;;  %v78_v26 = vld [vmem:[#allocation5 + $0xf0] sm:$0xff]  ;;  %p381_p6 = pnand %p380_p5, %p374_p2 }
  0x2f   :  { %v84_v22 = vld [vmem:[#allocation5 + $0x120] sm:$0xff]  ;;  %v90_v28 = vld [vmem:[#allocation5 + $0x150] sm:$0xff]  ;;  %v184_v30 = vadd.f32 %v82_v21, %v80_v20  ;;  %v150_v35 = vadd.f32 %v149_v24, %v70_v16  ;;  %v167_v36 = vadd.f32 %v166_v25, %v76_v18  ;;  %v133_v41 = vrot.slane %v132_v29, 4  ;;  %v49_v16 = vld [vmem:[#allocation5 + $0x8] sm:$0xff] }
  0x30   :  { %v88_v27 = vld [vmem:[#allocation5 + $0x140] sm:$0xff]  ;;  %v86_v31 = vld [vmem:[#allocation5 + $0x130] sm:$0xff]  ;;  %v116_v46 = vadd.f32 %v115_v34, %v114_v23 }
  0x31   :  { %v92_v32 = vld [vmem:[#allocation5 + $0x160] sm:$0xff]  ;;  %v202_v37 = vadd.f32 %v90_v28, %v88_v27  ;;  %v94_v38 = vld [vmem:[#allocation5 + $0x170] sm:$0xff]  ;;  %v185_v42 = vadd.f32 %v184_v30, %v84_v22  ;;  %v151_v47 = vrot.slane %v150_v35, 4  ;;  %v168_v48 = vadd.f32 %v167_v36, %v78_v26  ;;  %v53_v26 = vld [vmem:[#allocation5 + $0x28] sm:$0xff] }
  0x32   :  { %v96_v33 = vld [vmem:[#allocation5 + $0x180] sm:$0xff]  ;;  %v98_v39 = vld [vmem:[#allocation5 + $0x190] sm:$0xff]  ;;  %v134_v50 = vadd.f32 %v133_v41, %v132_v29  ;;  %v117_v56 = vrot.slane %v116_v46, 2  ;;  %v57_v30 = vld [vmem:[#allocation5 + $0x48] sm:$0xff] }
  0x33   :  { %v100_v40 = vld [vmem:[#allocation5 + $0x1a0] sm:$0xff]  ;;  %v106_v44 = vld [vmem:[#allocation5 + $0x1d0] sm:$0xff]  ;;  %v203_v49 = vadd.f32 %v202_v37, %v92_v32  ;;  %v186_v51 = vadd.f32 %v185_v42, %v86_v31  ;;  %v220_v52 = vadd.f32 %v98_v39, %v96_v33  ;;  %v152_v57 = vadd.f32 %v151_v47, %v150_v35  ;;  %v59_v31 = vld [vmem:[#allocation5 + $0x58] sm:$0xff] }
  0x34   :  { %v104_v43 = vld [vmem:[#allocation5 + $0x1c0] sm:$0xff]  ;;  %v102_v54 = vld [vmem:[#allocation5 + $0x1b0] sm:$0xff]  ;;  %v169_v58 = vrot.slane %v168_v48, 4  ;;  %v135_v60 = vrot.slane %v134_v50, 2  ;;  %v118_v0 = vadd.f32 %v117_v56, %v116_v46  ;;  %v121_v32 = vadd.f32 %v51_v17, %v49_v16  ;;  %v55_v37 = vld [vmem:[#allocation5 + $0x38] sm:$0xff] }
  0x35   :  { %v108_v45 = vld [vmem:[#allocation5 + $0x1e0] sm:$0xff]  ;;  %v238_v53 = vadd.f32 %v106_v44, %v104_v43  ;;  %v110_v55 = vld [vmem:[#allocation5 + $0x1f0] sm:$0xff]  ;;  %v204_v59 = vadd.f32 %v203_v49, %v94_v38  ;;  %v187_v61 = vrot.slane %v186_v51, 4  ;;  %v221_v62 = vadd.f32 %v220_v52, %v100_v40  ;;  %v65_v38 = vld [vmem:[#allocation5 + $0x88] sm:$0xff] }
  0x36   :  { %v153_v1 = vrot.slane %v152_v57, 2  ;;  %v170_v2 = vadd.f32 %v169_v58, %v168_v48  ;;  %v136_v4 = vadd.f32 %v135_v60, %v134_v50  ;;  %v119_v8 = vrot.slane %v118_v0, 1  ;;  %v67_v39 = vld [vmem:[#allocation5 + $0x98] sm:$0xff]  ;;  %v61_v43 = vld [vmem:[#allocation5 + $0x68] sm:$0xff] }
  0x37   :  { %v239_v63 = vadd.f32 %v238_v53, %v108_v45  ;;  %v205_v3 = vrot.slane %v204_v59, 4  ;;  %v188_v5 = vadd.f32 %v187_v61, %v186_v51  ;;  %v222_v6 = vadd.f32 %v221_v62, %v102_v54  ;;  %v63_v44 = vld [vmem:[#allocation5 + $0x78] sm:$0xff]  ;;  %v69_v49 = vld [vmem:[#allocation5 + $0xa8] sm:$0xff] }
  0x38   :  { %v154_v9 = vadd.f32 %v153_v1, %v152_v57  ;;  %v171_v10 = vrot.slane %v170_v2, 2  ;;  %v137_v12 = vrot.slane %v136_v4, 1  ;;  %v120_v18 = vadd.f32 %v119_v8, %v118_v0  ;;  %v73_v50 = vld [vmem:[#allocation5 + $0xc8] sm:$0xff]  ;;  %v75_v51 = vld [vmem:[#allocation5 + $0xd8] sm:$0xff] }
  0x39   :  { %v240_v7 = vadd.f32 %v239_v63, %v110_v55  ;;  %v206_v11 = vadd.f32 %v205_v3, %v204_v59  ;;  %v189_v13 = vrot.slane %v188_v5, 2  ;;  %v223_v14 = vrot.slane %v222_v6, 4  ;;  %v71_v55 = vld [vmem:[#allocation5 + $0xb8] sm:$0xff]  ;;  %v81_v56 = vld [vmem:[#allocation5 + $0x108] sm:$0xff] }
  0x3a   :  { %v155_v19 = vrot.slane %v154_v9, 1  ;;  %v172_v20 = vadd.f32 %v171_v10, %v170_v2  ;;  %v138_v22 = vadd.f32 %v137_v12, %v136_v4  ;;  %v122_v45 = vadd.f32 %v121_v32, %v53_v26  ;;  %v83_v57 = vld [vmem:[#allocation5 + $0x118] sm:$0xff]  ;;  %v77_v63 = vld [vmem:[#allocation5 + $0xe8] sm:$0xff] }
  0x3b   :  { %v241_v15 = vrot.slane %v240_v7, 4  ;;  %v207_v21 = vrot.slane %v206_v11, 2  ;;  %v190_v23 = vadd.f32 %v189_v13, %v188_v5  ;;  %v224_v24 = vadd.f32 %v223_v14, %v222_v6  ;;  %v89_v0 = vld [vmem:[#allocation5 + $0x148] sm:$0xff]  ;;  %v91_v1 = vld [vmem:[#allocation5 + $0x158] sm:$0xff] }
  0x3c   :  { %v156_v27 = vadd.f32 %v155_v19, %v154_v9  ;;  %v173_v28 = vrot.slane %v172_v20, 1  ;;  %v273_v36 = vsel %vm272_vm0, %v138_v22, %v120_v18  ;;  %v139_v52 = vadd.f32 %v59_v31, %v57_v30  ;;  %v85_v4 = vld [vmem:[#allocation5 + $0x128] sm:$0xff]  ;;  %v99_v6 = vld [vmem:[#allocation5 + $0x198] sm:$0xff] }
  0x3d   :  { %v242_v25 = vadd.f32 %v241_v15, %v240_v7  ;;  %v208_v29 = vadd.f32 %v207_v21, %v206_v11  ;;  %v191_v33 = vrot.slane %v190_v23, 1  ;;  %v225_v34 = vrot.slane %v224_v24, 2  ;;  %v97_v5 = vld [vmem:[#allocation5 + $0x188] sm:$0xff]  ;;  %v79_v12 = vld [vmem:[#allocation5 + $0xf8] sm:$0xff]  ;;  %v42_v15 = vld [vmem:[#allocation2] sm:$0xff] }
  0x3e   :  { %v174_v40 = vadd.f32 %v173_v28, %v172_v20  ;;  %v275_v42 = vsel %vm274_vm1, %v156_v27, %v273_v36  ;;  %v123_v58 = vadd.f32 %v122_v45, %v55_v37  ;;  %v157_v59 = vadd.f32 %v67_v39, %v65_v38  ;;  %v87_v16 = vld [vmem:[#allocation5 + $0x138] sm:$0xff]  ;;  %v93_v17 = vld [vmem:[#allocation5 + $0x168] sm:$0xff] }
  0x3f   :  { %v243_v35 = vrot.slane %v242_v25, 2  ;;  %v209_v41 = vrot.slane %v208_v29, 1  ;;  %v192_v46 = vadd.f32 %v191_v33, %v190_v23  ;;  %v226_v47 = vadd.f32 %v225_v34, %v224_v24  ;;  %v101_v23 = vld [vmem:[#allocation5 + $0x1a8] sm:$0xff]  ;;  %v95_v28 = vld [vmem:[#allocation5 + $0x178] sm:$0xff] }
  0x40   :  { %v277_v54 = vsel %vm276_vm2, %v174_v40, %v275_v42  ;;  %v140_v2 = vadd.f32 %v139_v52, %v61_v43  ;;  %v124_v7 = vrot.slane %v123_v58, 4  ;;  %v158_v8 = vadd.f32 %v157_v59, %v69_v49  ;;  %v107_v30 = vld [vmem:[#allocation5 + $0x1d8] sm:$0xff]  ;;  %v109_v39 = vld [vmem:[#allocation5 + $0x1e8] sm:$0xff] }
  0x41   :  { %v244_v48 = vadd.f32 %v243_v35, %v242_v25  ;;  %v210_v53 = vadd.f32 %v209_v41, %v208_v29  ;;  %v227_v60 = vrot.slane %v226_v47, 1  ;;  %v279_v62 = vsel %vm278_vm3, %v192_v46, %v277_v54  ;;  %v105_v29 = vld [vmem:[#allocation5 + $0x1c8] sm:$0xff]  ;;  %v103_v35 = vld [vmem:[#allocation5 + $0x1b8] sm:$0xff] }
  0x42   :  { %v175_v9 = vadd.f32 %v75_v51, %v73_v50  ;;  %v141_v13 = vadd.f32 %v140_v2, %v63_v44  ;;  %v193_v14 = vadd.f32 %v83_v57, %v81_v56  ;;  %v125_v18 = vadd.f32 %v124_v7, %v123_v58 }
  0x43   :  { %v245_v61 = vrot.slane %v244_v48, 1  ;;  %v281_v3 = vsel %vm280_vm4, %v210_v53, %v279_v62  ;;  %v228_v10 = vadd.f32 %v227_v60, %v226_v47  ;;  %v159_v19 = vadd.f32 %v158_v8, %v71_v55 }
  0x44   :  { %v176_v20 = vadd.f32 %v175_v9, %v77_v63  ;;  %v211_v21 = vadd.f32 %v91_v1, %v89_v0  ;;  %v142_v24 = vrot.slane %v141_v13, 4  ;;  %v194_v25 = vadd.f32 %v193_v14, %v85_v4 }
  0x45   :  { %v246_v11 = vadd.f32 %v245_v61, %v244_v48  ;;  %v283_v22 = vsel %vm282_vm5, %v228_v10, %v281_v3  ;;  %v229_v26 = vadd.f32 %v99_v6, %v97_v5  ;;  %v126_v31 = vrot.slane %v125_v18, 2  ;;  %v111_v48 = vld [vmem:[#allocation5 + $0x1f8] sm:$0xff] }
  0x46   :  { %v160_v32 = vrot.slane %v159_v19, 4  ;;  %v177_v33 = vadd.f32 %v176_v20, %v79_v12  ;;  %v143_v36 = vadd.f32 %v142_v24, %v141_v13  ;;  %v195_v37 = vadd.f32 %v194_v25, %v87_v16 }
  0x47   :  { %v285_v27 = vsel %vm284_vm6, %v246_v11, %v283_v22  ;;  %v212_v38 = vadd.f32 %v211_v21, %v93_v17  ;;  %v127_v40 = vadd.f32 %v126_v31, %v125_v18  ;;  %v230_v43 = vadd.f32 %v229_v26, %v101_v23  ;;  %v43_v31 = vld [vmem:[#allocation2 + $0x8] sm:$0xff] }
  0x48   :  { %v295_v34 = vadd.f32 %v285_v27, %v42_v15  ;;  %v161_v41 = vadd.f32 %v160_v32, %v159_v19  ;;  %v178_v42 = vrot.slane %v177_v33, 4  ;;  %v144_v44 = vrot.slane %v143_v36, 2 }
  0x49   :  { %v196_v45 = vrot.slane %v195_v37, 4  ;;  %v213_v46 = vadd.f32 %v212_v38, %v95_v28  ;;  %v247_v47 = vadd.f32 %v107_v30, %v105_v29  ;;  %v128_v49 = vrot.slane %v127_v40, 1 }
  0x4a   :  { %v162_v50 = vrot.slane %v161_v41, 2  ;;  %v179_v51 = vadd.f32 %v178_v42, %v177_v33  ;;  %v231_v52 = vadd.f32 %v230_v43, %v103_v35  ;;  %v145_v53 = vadd.f32 %v144_v44, %v143_v36 }
  0x4b   :  { %v197_v54 = vadd.f32 %v196_v45, %v195_v37  ;;  %v214_v55 = vrot.slane %v213_v46, 4  ;;  %v248_v56 = vadd.f32 %v247_v47, %v109_v39  ;;  %v129_v57 = vadd.f32 %v128_v49, %v127_v40 }
  0x4c   :  { %v163_v58 = vadd.f32 %v162_v50, %v161_v41  ;;  %v180_v59 = vrot.slane %v179_v51, 2  ;;  %v232_v60 = vrot.slane %v231_v52, 4  ;;  %v146_v61 = vrot.slane %v145_v53, 1 }
  0x4d   :  { %v198_v62 = vrot.slane %v197_v54, 2  ;;  %v215_v63 = vadd.f32 %v214_v55, %v213_v46  ;;  %v249_v0 = vadd.f32 %v248_v56, %v111_v48  ;;  %v304_v4 = vmul.f32 0.030303031, %v295_v34 }
  0x4e   :  { %v164_v1 = vrot.slane %v163_v58, 1  ;;  %v181_v2 = vadd.f32 %v180_v59, %v179_v51  ;;  %v233_v3 = vadd.f32 %v232_v60, %v231_v52  ;;  %v147_v5 = vadd.f32 %v146_v61, %v145_v53 }
  0x4f   :  { %v199_v6 = vadd.f32 %v198_v62, %v197_v54  ;;  %v216_v7 = vrot.slane %v215_v63, 2  ;;  %v250_v8 = vrot.slane %v249_v0, 4  ;;  %306 = vst [vmem:[#allocation7] sm:$0xff] %v304_v4 }
  0x50   :  { %v165_v9 = vadd.f32 %v164_v1, %v163_v58  ;;  %v182_v10 = vrot.slane %v181_v2, 1  ;;  %v234_v11 = vrot.slane %v233_v3, 2  ;;  %v286_v15 = vsel %vm272_vm0, %v147_v5, %v129_v57 }
  0x51   :  { %v200_v12 = vrot.slane %v199_v6, 1  ;;  %v217_v13 = vadd.f32 %v216_v7, %v215_v63  ;;  %v251_v14 = vadd.f32 %v250_v8, %v249_v0 }
  0x52   :  { %v183_v16 = vadd.f32 %v182_v10, %v181_v2  ;;  %v235_v17 = vadd.f32 %v234_v11, %v233_v3  ;;  %v287_v18 = vsel %vm274_vm1, %v165_v9, %v286_v15 }
  0x53   :  { %v201_v19 = vadd.f32 %v200_v12, %v199_v6  ;;  %v218_v20 = vrot.slane %v217_v13, 1  ;;  %v252_v21 = vrot.slane %v251_v14, 2 }
  0x54   :  { %v236_v22 = vrot.slane %v235_v17, 1  ;;  %v288_v23 = vsel %vm276_vm2, %v183_v16, %v287_v18 }
  0x55   :  { %v219_v24 = vadd.f32 %v218_v20, %v217_v13  ;;  %v253_v25 = vadd.f32 %v252_v21, %v251_v14  ;;  %v289_v26 = vsel %vm278_vm3, %v201_v19, %v288_v23 }
  0x56   :  { %v237_v27 = vadd.f32 %v236_v22, %v235_v17 }
  0x57   :  { %v254_v28 = vrot.slane %v253_v25, 1  ;;  %v290_v29 = vsel %vm280_vm4, %v219_v24, %v289_v26 }
  0x58   :  { %v291_v30 = vsel %vm282_vm5, %v237_v27, %v290_v29 }
  0x59   :  { %v255_v32 = vadd.f32 %v254_v28, %v253_v25 }
  0x5b   :  { %v292_v33 = vsel %vm284_vm6, %v255_v32, %v291_v30 }
  0x5c   :  { %v296_v34 = vadd.f32 %v292_v33, %v43_v31 }
  0x5e   :  { %v305_v35 = vmul.f32 0.030303031, %v296_v34 }
  0x60   :  { %307 = vst [vmem:[#allocation7 + $0x8] sm:$0xff] %v305_v35 }
  0x61   :  { %384 = shalt.err (!%p381_p6)
}
  0x62   :  { %s385_s10 = scalar_lea.hbm %s480_s2, 256 }
  0x63   :  { %p386_p7 = scmp.ne.s32.totalorder %s480_s2, %s385_s10  ;;  %p389_p8 = scmp.lt.u32.totalorder %s385_s10, %s480_s2 }
  0x65   :  { %p391_p9 = pnand %p389_p8, %p386_p7 }
  0x67   :  { %394 = shalt.err (!%p391_p9)
}
  0x68   :  { %317 = dma.vmem_to_hbm [thread:$0]  %s315_s6, 256, %s480_s2, [#allocation4]  }
  0x69   :  { %399 = dma.done.wait [#allocation4], 256  }
  0x6a   :  { %400 = vsyncadd [#allocation4], 4294967040 }
  0x6b   :  { %321 = vsyncpa [#allocation3], 1 }
  0x6c   :  { %322 = vsyncpa [#allocation6], 1 }
  0x6d   :  { %323 = vsyncpa [#allocation4], 1 }

</bundles_post_ra>
